<compile_context>
chip_gen: v6e
topology: v6e:2x2x1
jax: 0.10.0
libtpu: 0.0.40
codegen_flags: <defaults>
</compile_context>

<pallas_src>
import functools

import jax
import jax.numpy as jnp
from jax import lax
from jax.experimental import pallas as pl
from jax.experimental.pallas import tpu as pltpu


def _round_up(n, m):
    return ((n + m - 1) // m) * m


def _tpu_generation_params():
    """Best-effort chip detection -> (vmem_capacity_bytes, target_rows, min_steps)."""
    kind = ""
    try:
        kind = jax.devices()[0].device_kind.lower()
    except Exception:
        pass
    vmem_cap = None
    try:
        vmem_cap = int(pltpu.get_tpu_info().vmem_capacity_bytes)
    except Exception:
        vmem_cap = None
    if "v7" in kind:
        # 64 MiB VMEM per TC, 2 TCs -> want >= 8 grid steps so each core pipelines.
        return (vmem_cap or 64 * 2**20), 256, 8
    if "v5" in kind:
        # v5e: 128-row MXU; 128-row blocks already saturate it, 128 MiB VMEM.
        return (vmem_cap or 128 * 2**20), 128, 4
    if "v6" in kind:
        return (vmem_cap or 128 * 2**20), 256, 4
    # Unknown: be conservative on VMEM.
    return (vmem_cap or 64 * 2**20), 256, 4


def _pick_batch_block(B, rows_per_batch, target_rows, min_steps, fits):
    """Largest divisor of B feeding ~target_rows rows to the projection matmul,
    with at least `min_steps` grid steps (pipeline overlap / megacore) and a
    per-step VMEM footprint that fits the budget."""
    min_steps = max(1, min(min_steps, B))
    best = 1
    for bb in range(1, B + 1):
        if B % bb:
            continue
        if B // bb < min_steps:
            continue
        if bb > 1 and bb * rows_per_batch > target_rows:
            continue
        if not fits(bb):
            continue
        best = bb
    return best


def seq_attn_match_kernel(*refs, identity, approx_recip):
    if identity:
        x_ref, y_ref, nmask_ref, o_ref = refs
    else:
        x_ref, y_ref, nmask_ref, w_ref, b_ref, o_ref = refs

    bb, l1, h = x_ref.shape
    _, l2, _ = y_ref.shape

    if identity:
        x_proj = x_ref[...]
        y_proj = y_ref[...]
    else:
        w = w_ref[...]
        b = b_ref[...].astype(jnp.float32)                     # (1, h)
        x2d = x_ref[...].reshape(bb * l1, h)
        y2d = y_ref[...].reshape(bb * l2, h)
        # Two MXU matmuls against the resident W block (no in-kernel concat /
        # activation copy).  f32 accumulation, ReLU in f32.
        xp = jnp.dot(x2d, w, preferred_element_type=jnp.float32) + b
        yp = jnp.dot(y2d, w, preferred_element_type=jnp.float32) + b
        x_proj = jnp.maximum(xp, 0.0).reshape(bb, l1, h).astype(x_ref.dtype)
        y_proj = jnp.maximum(yp, 0.0).reshape(bb, l2, h).astype(y_ref.dtype)

    # scores[b,i,j] = <x_proj[b,i,:], y_proj[b,j,:]> -- contract last dims
    # directly (no transpose / XLU relayout).
    scores = lax.dot_general(
        x_proj, y_proj,
        dimension_numbers=(((2,), (2,)), ((0,), (0,))),
        preferred_element_type=jnp.float32)                    # (bb, l1, l2)

    # Additive mask: 0 for valid, -1e30 for padding (finite -> no NaN hazard).
    scores = scores + nmask_ref[...]

    # Masked softmax over L2 (all f32); denominator via EUP reciprocal in the
    # fast path (idle slot).
    smax = jnp.max(scores, axis=-1, keepdims=True)
    p = jnp.exp(scores - smax)
    denom = jnp.sum(p, axis=-1, keepdims=True)
    alpha = p * pl.reciprocal(denom, approx=approx_recip)

    # Weighted sum over the (unprojected) y.
    matched = lax.dot_general(
        alpha.astype(y_ref.dtype), y_ref[...],
        dimension_numbers=(((2,), (1,)), ((0,), (0,))),
        preferred_element_type=jnp.float32)                    # (bb, l1, h)

    o_ref[...] = matched.astype(o_ref.dtype)


def seq_attn_match(x, y, y_mask, w_t=None, bias=None, *,
                   identity=False, matmul_dtype=jnp.bfloat16,
                   target_rows=None, min_steps=None):
    """x: (B, L1, H), y: (B, L2, H), y_mask: (B, L2) {0,1} (1 = padding),
    w_t: (H, H) = W.T of nn.Linear (proj = v @ w_t + bias), bias: (H,)."""
    B, L1, H = x.shape
    _, L2, _ = y.shape
    out_dtype = x.dtype
    cd = jnp.dtype(matmul_dtype)

    vmem_cap, gen_rows, gen_steps = _tpu_generation_params()
    target_rows = gen_rows if target_rows is None else target_rows
    min_steps = gen_steps if min_steps is None else min_steps

    # Lane-dense padding of H only when it pays off: H >= 128 and <= 25% extra.
    # Small H uses full-dim blocks directly (legal; avoids 4x HBM inflation).
    Hp = H
    if H >= 128 and H % 128 != 0 and _round_up(H, 128) * 4 <= H * 5:
        Hp = _round_up(H, 128)
    if Hp != H:
        dh = Hp - H
        # Zero padding is exact: padded W rows/cols and bias are zero, padded
        # features stay 0 through relu/scores, padded out columns sliced off.
        x = jnp.pad(x, ((0, 0), (0, 0), (0, dh)))
        y = jnp.pad(y, ((0, 0), (0, 0), (0, dh)))
        if not identity:
            w_t = jnp.pad(w_t, ((0, dh), (0, dh)))
            bias = jnp.pad(bias, (0, dh))

    x_c = x.astype(cd)
    y_c = y.astype(cd)
    neg_mask = (y_mask.astype(jnp.float32) * jnp.float32(-1e30)).reshape(B, 1, L2)

    itm = cd.itemsize
    o_itm = jnp.dtype(out_dtype).itemsize

    def _vmem_bytes(bb):
        rx, ry = bb * L1, bb * L2
        est = (2 * (rx + ry) * Hp * itm            # x / y blocks (double-buffered)
               + 2 * bb * L2 * 4                   # additive-mask blocks
               + 2 * rx * Hp * o_itm               # output block (double-buffered)
               + bb * L1 * L2 * (3 * 4 + itm)      # scores, p, alpha (f32) + cast
               + rx * Hp * 4)                      # matched accumulator (f32)
        if not identity:
            est += (2 * (Hp * Hp + Hp) * itm       # W + bias (resident, 2 buffers)
                    + (rx + ry) * Hp * (4 + itm))  # x/y projections (f32 + cast)
        return est

    cap = max(32 * 2**20, int(vmem_cap * 0.82))
    BB = _pick_batch_block(B, max(L1, L2), target_rows, min_steps,
                           fits=lambda bb: int(1.3 * _vmem_bytes(bb)) <= cap)
    grid = (B // BB,)
    vmem_limit = max(32 * 2**20, min(cap, int(1.3 * _vmem_bytes(BB))))

    kernel = functools.partial(
        seq_attn_match_kernel,
        identity=identity,
        approx_recip=(cd != jnp.dtype(jnp.float32)))

    in_specs = [
        pl.BlockSpec((BB, L1, Hp), lambda i: (i, 0, 0)),   # x
        pl.BlockSpec((BB, L2, Hp), lambda i: (i, 0, 0)),   # y
        pl.BlockSpec((BB, 1, L2), lambda i: (i, 0, 0)),    # additive mask
    ]
    args = [x_c, y_c, neg_mask]
    if not identity:
        # Grid-invariant operands: same block every step, stays resident.
        # (pl.Buffered(1) would also single-buffer them; left at the default
        # for portability -- W is small next to the activation blocks here.)
        in_specs += [pl.BlockSpec((Hp, Hp), lambda i: (0, 0)),   # W.T
                     pl.BlockSpec((1, Hp), lambda i: (0, 0))]    # bias
        args += [w_t.astype(cd), bias.reshape(1, Hp).astype(cd)]

    out = pl.pallas_call(
        kernel,
        out_shape=jax.ShapeDtypeStruct((B, L1, Hp), out_dtype),
        grid=grid,
        in_specs=in_specs,
        out_specs=pl.BlockSpec((BB, L1, Hp), lambda i: (i, 0, 0)),
        compiler_params=pltpu.CompilerParams(
            dimension_semantics=("parallel",),
            vmem_limit_bytes=int(vmem_limit)),
    )(*args)

    return out[..., :H] if Hp != H else out


def seq_attn_match_ref(x, y, y_mask, w_t=None, bias=None, identity=False):
    """Pure-JAX f32 reference matching the PyTorch forward."""
    if identity:
        x_proj, y_proj = x, y
    else:
        x_proj = jax.nn.relu(jnp.einsum("blh,hk->blk", x, w_t) + bias)
        y_proj = jax.nn.relu(jnp.einsum("blh,hk->blk", y, w_t) + bias)
    scores = jnp.einsum("bik,bjk->bij", x_proj, y_proj)
    scores = jnp.where(y_mask[:, None, :] > 0.5, -jnp.inf, scores)
    alpha = jax.nn.softmax(scores, axis=-1)
    return jnp.einsum("bij,bjh->bih", alpha, y)


if __name__ == "__main__":
    B, L1, L2, H = 8, 8, 16, 32

    key = jax.random.PRNGKey(0)
    kx, ky, kw, kb = jax.random.split(key, 4)

    x = jax.random.normal(kx, (B, L1, H), dtype=jnp.float32)
    y = jax.random.normal(ky, (B, L2, H), dtype=jnp.float32)

    # Deterministic nn.Linear(H, H) params; pass W.T so proj = v @ w_t + bias.
    W = jax.random.normal(kw, (H, H), dtype=jnp.float32) * (1.0 / jnp.sqrt(H))
    bias = jax.random.normal(kb, (H,), dtype=jnp.float32) * 0.1
    w_t = W.T

    # y_mask: 1 for padding, 0 for true tokens (tail-padded sequences).
    valid_lens = jnp.array([12, 9, 16, 5, 1, 8, 13, 3], dtype=jnp.int32)
    pos = jnp.arange(L2)[None, :]
    y_mask = (pos >= valid_lens[:, None]).astype(jnp.float32)   # (B, L2)

    # --- Linear-projection variant ---
    ref = seq_attn_match_ref(x, y, y_mask, w_t, bias)

    out_f32 = jax.block_until_ready(
        seq_attn_match(x, y, y_mask, w_t, bias, matmul_dtype=jnp.float32))
    assert out_f32.shape == (B, L1, H)
    assert jnp.allclose(out_f32, ref, atol=1e-4, rtol=1e-4), "f32 mismatch"

    out_bf16 = jax.block_until_ready(
        seq_attn_match(x, y, y_mask, w_t, bias, matmul_dtype=jnp.bfloat16))
    assert out_bf16.shape == (B, L1, H)
    assert jnp.allclose(out_bf16, ref, atol=5e-2, rtol=5e-2), "bf16 mismatch"

    # --- identity=True variant (no linear projection) ---
    ref_id = seq_attn_match_ref(x, y, y_mask, identity=True)
    out_id = jax.block_until_ready(
        seq_attn_match(x, y, y_mask, identity=True, matmul_dtype=jnp.float32))
    assert out_id.shape == (B, L1, H)
    assert jnp.allclose(out_id, ref_id, atol=1e-4, rtol=1e-4), "identity mismatch"

    print("KERNEL_OK")
</pallas_src>

<mosaic_0001>
module attributes {stable_mosaic.version = 11 : i64} {
  func.func @seq_attn_match_kernel(%arg0: i32, %arg1: memref<2x8x32xf32, #tpu.memory_space<vmem>>, %arg2: memref<2x16x32xf32, #tpu.memory_space<vmem>>, %arg3: memref<2x1x16xf32, #tpu.memory_space<vmem>>, %arg4: memref<32x32xf32, #tpu.memory_space<vmem>>, %arg5: memref<1x32xf32, #tpu.memory_space<vmem>>, %arg6: memref<2x8x32xf32, #tpu.memory_space<vmem>>) attributes {dimension_semantics = [#tpu.dimension_semantics<parallel>], iteration_bounds = array<i64: 4>, scalar_prefetch = 0 : i64, scratch_operands = 0 : i64, tpu.core_type = #tpu.core_type<tc>, window_params = [{transform_indices = @transform_0, window_bounds = array<i64: 2, 8, 32>}, {transform_indices = @transform_1, window_bounds = array<i64: 2, 16, 32>}, {transform_indices = @transform_2, window_bounds = array<i64: 2, 1, 16>}, {pipeline_mode = #tpu.pipeline_mode<synchronous>, transform_indices = @transform_3, window_bounds = array<i64: 32, 32>}, {pipeline_mode = #tpu.pipeline_mode<synchronous>, transform_indices = @transform_4, window_bounds = array<i64: 1, 32>}, {transform_indices = @transform_5, window_bounds = array<i64: 2, 8, 32>}]} {
    %c0 = arith.constant 0 : index
    %c0_0 = arith.constant 0 : index
    %0 = vector.load %arg4[%c0, %c0_0] : memref<32x32xf32, #tpu.memory_space<vmem>>, vector<32x32xf32>
    %c0_1 = arith.constant 0 : index
    %c0_2 = arith.constant 0 : index
    %1 = vector.load %arg5[%c0_1, %c0_2] : memref<1x32xf32, #tpu.memory_space<vmem>>, vector<1x32xf32>
    %c0_3 = arith.constant 0 : index
    %c0_4 = arith.constant 0 : index
    %c0_5 = arith.constant 0 : index
    %2 = vector.load %arg1[%c0_3, %c0_4, %c0_5] : memref<2x8x32xf32, #tpu.memory_space<vmem>>, vector<2x8x32xf32>
    %3 = vector.shape_cast %2 : vector<2x8x32xf32> to vector<16x32xf32>
    %c0_6 = arith.constant 0 : index
    %c0_7 = arith.constant 0 : index
    %c0_8 = arith.constant 0 : index
    %4 = vector.load %arg2[%c0_6, %c0_7, %c0_8] : memref<2x16x32xf32, #tpu.memory_space<vmem>>, vector<2x16x32xf32>
    %5 = vector.shape_cast %4 : vector<2x16x32xf32> to vector<32x32xf32>
    %cst = arith.constant dense<0.000000e+00> : vector<16x32xf32>
    %6 = tpu.matmul %3, %0, %cst {dimension_numbers = #tpu.dot_dimension_numbers<[1], [0], [0], [1], [0, 0, 1, 1], [], []>} : vector<16x32xf32>, vector<32x32xf32>, vector<16x32xf32> -> vector<16x32xf32>
    %7 = vector.broadcast %1 : vector<1x32xf32> to vector<16x32xf32>
    %8 = arith.addf %6, %7 : vector<16x32xf32>
    %cst_9 = arith.constant dense<0.000000e+00> : vector<32x32xf32>
    %9 = tpu.matmul %5, %0, %cst_9 {dimension_numbers = #tpu.dot_dimension_numbers<[1], [0], [0], [1], [0, 0, 1, 1], [], []>} : vector<32x32xf32>, vector<32x32xf32>, vector<32x32xf32> -> vector<32x32xf32>
    %10 = vector.broadcast %1 : vector<1x32xf32> to vector<32x32xf32>
    %11 = arith.addf %9, %10 : vector<32x32xf32>
    %cst_10 = arith.constant 0.000000e+00 : f32
    %12 = vector.broadcast %cst_10 : f32 to vector<16x32xf32>
    %13 = arith.maximumf %8, %12 : vector<16x32xf32>
    %14 = vector.shape_cast %13 : vector<16x32xf32> to vector<2x8x32xf32>
    %cst_11 = arith.constant 0.000000e+00 : f32
    %15 = vector.broadcast %cst_11 : f32 to vector<32x32xf32>
    %16 = arith.maximumf %11, %15 : vector<32x32xf32>
    %17 = vector.shape_cast %16 : vector<32x32xf32> to vector<2x16x32xf32>
    %cst_12 = arith.constant dense<0.000000e+00> : vector<2x8x16xf32>
    %18 = tpu.matmul %14, %17, %cst_12 {dimension_numbers = #tpu.dot_dimension_numbers<[2], [2], [1], [1], [0, 0, 0, 1, 1, 1], [0], [0]>} : vector<2x8x32xf32>, vector<2x16x32xf32>, vector<2x8x16xf32> -> vector<2x8x16xf32>
    %c0_13 = arith.constant 0 : index
    %c0_14 = arith.constant 0 : index
    %c0_15 = arith.constant 0 : index
    %19 = vector.load %arg3[%c0_13, %c0_14, %c0_15] : memref<2x1x16xf32, #tpu.memory_space<vmem>>, vector<2x1x16xf32>
    %20 = vector.broadcast %19 : vector<2x1x16xf32> to vector<2x8x16xf32>
    %21 = arith.addf %18, %20 : vector<2x8x16xf32>
    %cst_16 = arith.constant dense<0xFF800000> : vector<2x8xf32>
    %22 = vector.multi_reduction <maximumf>, %21, %cst_16 [2] : vector<2x8x16xf32> to vector<2x8xf32>
    %23 = vector.shape_cast %22 : vector<2x8xf32> to vector<2x8x1xf32>
    %24 = vector.broadcast %23 : vector<2x8x1xf32> to vector<2x8x16xf32>
    %25 = arith.subf %21, %24 : vector<2x8x16xf32>
    %26 = math.exp %25 : vector<2x8x16xf32>
    %cst_17 = arith.constant dense<0.000000e+00> : vector<2x8xf32>
    %27 = vector.multi_reduction <add>, %26, %cst_17 [2] : vector<2x8x16xf32> to vector<2x8xf32>
    %28 = vector.shape_cast %27 : vector<2x8xf32> to vector<2x8x1xf32>
    %29 = tpu.reciprocal %28 : vector<2x8x1xf32> -> vector<2x8x1xf32>
    %30 = vector.broadcast %29 : vector<2x8x1xf32> to vector<2x8x16xf32>
    %31 = arith.mulf %26, %30 : vector<2x8x16xf32>
    %c0_18 = arith.constant 0 : index
    %c0_19 = arith.constant 0 : index
    %c0_20 = arith.constant 0 : index
    %32 = vector.load %arg2[%c0_18, %c0_19, %c0_20] : memref<2x16x32xf32, #tpu.memory_space<vmem>>, vector<2x16x32xf32>
    %cst_21 = arith.constant dense<0.000000e+00> : vector<2x8x32xf32>
    %33 = tpu.matmul %31, %32, %cst_21 {dimension_numbers = #tpu.dot_dimension_numbers<[2], [1], [1], [2], [0, 0, 0, 1, 1, 2], [0], [0]>} : vector<2x8x16xf32>, vector<2x16x32xf32>, vector<2x8x32xf32> -> vector<2x8x32xf32>
    %c0_22 = arith.constant 0 : index
    %c0_23 = arith.constant 0 : index
    %c0_24 = arith.constant 0 : index
    %34 = vector.load %arg6[%c0_22, %c0_23, %c0_24] : memref<2x8x32xf32, #tpu.memory_space<vmem>>, vector<2x8x32xf32>
    tpu.vector_store %arg6[%c0_22, %c0_23, %c0_24], %33 {strides = array<i32>} : memref<2x8x32xf32, #tpu.memory_space<vmem>>, vector<2x8x32xf32>,
    return
  }
  func.func @transform_0(%arg0: i32) -> (i32, i32, i32) {
    %c0_i32 = arith.constant 0 : i32
    %c0_i32_0 = arith.constant 0 : i32
    %c0_i32_1 = arith.constant 0 : i32
    return %arg0, %c0_i32, %c0_i32_0 : i32, i32, i32
  }
  func.func @transform_1(%arg0: i32) -> (i32, i32, i32) {
    %c0_i32 = arith.constant 0 : i32
    %c0_i32_0 = arith.constant 0 : i32
    %c0_i32_1 = arith.constant 0 : i32
    return %arg0, %c0_i32, %c0_i32_0 : i32, i32, i32
  }
  func.func @transform_2(%arg0: i32) -> (i32, i32, i32) {
    %c0_i32 = arith.constant 0 : i32
    %c0_i32_0 = arith.constant 0 : i32
    %c0_i32_1 = arith.constant 0 : i32
    return %arg0, %c0_i32, %c0_i32_0 : i32, i32, i32
  }
  func.func @transform_3(%arg0: i32) -> (i32, i32) {
    %c0_i32 = arith.constant 0 : i32
    %c0_i32_0 = arith.constant 0 : i32
    %c0_i32_1 = arith.constant 0 : i32
    return %c0_i32, %c0_i32_0 : i32, i32
  }
  func.func @transform_4(%arg0: i32) -> (i32, i32) {
    %c0_i32 = arith.constant 0 : i32
    %c0_i32_0 = arith.constant 0 : i32
    %c0_i32_1 = arith.constant 0 : i32
    return %c0_i32, %c0_i32_0 : i32, i32
  }
  func.func @transform_5(%arg0: i32) -> (i32, i32, i32) {
    %c0_i32 = arith.constant 0 : i32
    %c0_i32_0 = arith.constant 0 : i32
    %c0_i32_1 = arith.constant 0 : i32
    return %arg0, %c0_i32, %c0_i32_0 : i32, i32, i32
  }
}

</mosaic_0001>

<bundles_post_ra>
// kernel: tpu_custom_call.1
= control target key start
LH: loop header
LB: loop body
LE: loop exit
PB: predicated region body
PF: predicated region fallthrough
CT: control target
= control target key end

     0   :  { %s1775_s0 = inlined_call_operand.hbm [shape: f32[8,8,32], index: 0, kind: input, shape index: {}]   ;;  %s1776_s1 = inlined_call_operand.hbm [shape: f32[8,16,32], index: 1, kind: input, shape index: {}]   ;;  %s1777_s2 = inlined_call_operand.hbm [shape: f32[8,1,16], index: 2, kind: input, shape index: {}]   ;;  %s1778_s3 = inlined_call_operand.hbm [shape: f32[32,32], index: 3, kind: input, shape index: {}]   ;;  %s1779_s4 = inlined_call_operand.vmem [shape: f32[1,32], index: 4, kind: input, shape index: {}]   ;;  %s1780_s5 = inlined_call_operand.hbm [shape: f32[8,8,32], index: 5, kind: output, shape index: {}]  }
   0x1   :  { %1793 = sst [smem:[#allocation18_spill]] %s1776_s1 }
   0x2   :  { %10 = vsyncpa [#allocation3], 0 }
   0x3   :  { %12 = vsyncpa [#allocation3 + $0x1], 0 }
   0x4   :  { %13 = vsyncpa [#allocation6], 0 }
   0x5   :  { %15 = vsyncpa [#allocation6 + $0x1], 0 }
   0x6   :  { %16 = vsyncpa [#allocation9], 0 }
   0x7   :  { %17 = vsyncpa [#allocation4], 0 }
   0x8   :  { %19 = vsyncpa [#allocation4 + $0x1], 0  ;;  %s1461_s18 = smov 0   ;;  %s1463_s19 = smov 0  }
   0x9   :  { %s1465_s20 = smov 0   ;;  %s1467_s21 = smov 0  }
   0xa LB: > { %1794 = sst [smem:[#allocation15_spill]] %s1412_s20  ;;  %s1482_s22 = sadd.s32 1, %s1416_s21   ;;  %s1416_s21 = sphi %s1467_s21, %s1815_s21   ;;  %s1412_s20 = sphi %s1465_s20, %s1817_s20   ;;  %s1408_s19 = sphi %s1463_s19, %s1819_s19   ;;  %s1404_s18 = sphi %s1461_s18, %s1818_s18  }
   0xb   : > { %1795 = sst [smem:[#allocation16_spill]] %s1482_s22  ;;  %s32_s23 = sadd.s32 1, %s1412_s20 }
   0xc   : > { %s29_s24 = ssub.s32 %s1416_s21, %s1482_s22  ;;  %p1781_p0 = scmp.ne.s32.totalorder %s1412_s20, %s1408_s19 }
   0xd   : > { %p30_p1 = scmp.eq.s32.totalorder %s29_s24, 0  ;;  %p40_p2 = scmp.eq.s32.totalorder %s1416_s21, 0 }
   0xe   : > { %p1182_p4 = scmp.lt.s32.totalorder %s1416_s21, 4  ;;  %s1498_s26 = sand.u32 1, %s1412_s20  }
   0xf   : > { %s1491_s25 = scalar_select %p30_p1, %s1412_s20, %s32_s23  }
  0x10   : > { %p41_p3 = por %p40_p2, %p1781_p0  ;;  %s226_s27 = sand.u32 1, %s1416_s21  }
  0x11   : > { %1796 = sst [smem:[#allocation17_spill]] %s1491_s25  ;;  %s1032_s28 = sshll.u32 %s1498_s26, 5 }
  0x12   : > { %p1502_p5 = pnand %p1182_p4, %p41_p3  ;;  %s1069_s30 = sshll.u32 %s1416_s21, 9 }
  0x13   : > { %s1798_s1 = sld [smem:[#allocation18_spill]]  ;;  %s230_s9 = scalar_lea.vmem [#allocation5], %s1032_s28 }
  0x14   : > { %s238_s10 = sshll.u32 %s230_s9, 4  ;;  %s1514_s11 = scalar_lea.sflag [#allocation6], %s226_s27  ;;  %s1512_s10 = int_to_ptr.vmem [resolvable:$true] %s238_s10 }
  0x15   : > { %p1520_p7 = pneg %p1502_p5 }
  0x19   : > { %s1510_s8 = scalar_lea.hbm %s1798_s1, %s1069_s30  ;;  %s1239_s16 = scalar_lea.hbm %s1798_s1, 2048 }
  0x1a   : > { %s1234_s12 = scalar_lea.hbm %s1510_s8, 512  ;;  %p1240_p10 = scmp.lt.s32.totalorder %s1510_s8, %s1798_s1 }
  0x1b   : > { %p1235_p6 = scmp.ne.s32.totalorder %s1510_s8, %s1234_s12  ;;  %p1241_p11 = scmp.lt.s32.totalorder %s1239_s16, %s1234_s12 }
  0x1d   : > { %p1237_p8 = pnand %p1520_p7, %p1235_p6  ;;  %p1242_p12 = por %p1241_p11, %p1240_p10 }
  0x1f   : > { %p1238_p9 = pneg %p1237_p8 }
  0x21   : > { %p1243_p13 = pnand %p1242_p12, %p1238_p9 }
  0x23   : > { %1246 = shalt.err (!%p1243_p13)
}
  0x24   : > { %s1247_s24 = scalar_lea.vmem %s1512_s10, 512  ;;  %s1418_s27 = smov [#allocation5]  }
  0x25   : > { %p1248_p1 = scmp.ne.s32.totalorder %s1512_s10, %s1247_s24  ;;  %s1252_s28 = sshll.u32 %s1418_s27, 4  ;;  %s1253_s28 = int_to_ptr.vmem [resolvable:$false] %s1252_s28 }
  0x26   : > { %s1254_s30 = scalar_lea.vmem %s1253_s28, 1024  ;;  %p1255_p4 = scmp.lt.s32.totalorder %s1512_s10, %s1253_s28 }
  0x27   : > { %p1250_p2 = pnand %p1248_p1, %p1520_p7  ;;  %p1256_p6 = scmp.lt.s32.totalorder %s1254_s30, %s1247_s24 }
  0x29   : > { %p1251_p3 = pneg %p1250_p2  ;;  %p1257_p8 = por %p1256_p6, %p1255_p4 }
  0x2b   : > { %p1258_p0 = pnand %p1257_p8, %p1251_p3 }
  0x2d   : > { %1261 = shalt.err (!%p1258_p0)
}
  0x2e   : > { %s1782_s6 = smov 128   ;;  %s1784_s7 = smov 8  }
  0x2f   : > { %1173 = dma.hbm_to_vmem [thread:$0]  (!%p1502_p5), %s1510_s8, 512, %s1512_s10, %s1514_s11, %s1782_s6, %s1782_s6, %s1784_s7  }
  0x30   : > { %s1547_s9 = sadd.s32 4294967295, %s1416_s21   ;;  %s1025_s12 = sadd.s32 4294967294, %s1416_s21  }
  0x31   : > { %p45_p0 = scmp.ne.s32.totalorder %s1408_s19, %s1404_s18  ;;  %p1786_p9 = scmp.eq.s32.totalorder %s1547_s9, 0 }
  0x32   : > { %p163_p10 = scmp.eq.s32.totalorder %s1547_s9, 3  ;;  %p169_p11 = scmp.eq.s32.totalorder %s1025_s12, 3 }
  0x33   : > { %p1556_p12 = por %p1786_p9, %p45_p0  ;;  %p1026_p13 = scmp.ge.s32.totalorder %s1416_s21, 1 }
  0x34   : > { %p1801_p1 = scmp.ne.s32.totalorder %s1412_s20, %s1408_s19  ;;  %p1568_p3 = por %p169_p11, %p45_p0 }
  0x35   : > { %s1800_s14 = scalar_select %p1556_p12, 1, 0 }
  0x36   : > { %p1564_p2 = por %p163_p10, %p1801_p1  ;;  %p176_p4 = scmp.lt.s32.totalorder %s1416_s21, 5 }
  0x37   : > { %s1803_s10 = scalar_select %p1568_p3, 1, 0 }
  0x38   : > { %s1802_s8 = scalar_select %p1564_p2, 1, 0 }
  0x39   : > { %p1573_p6 = pnand %p1026_p13, %p176_p4  ;;  %s1421_s16 = smov [#allocation8]  }
  0x3a   : > { %s188_s17 = sshll.u32 %s1421_s16, 4  ;;  %s1029_s23 = sshll.u32 %s1498_s26, 4  ;;  %s189_s17 = int_to_ptr.vmem [resolvable:$true] %s188_s17 }
  0x3b   : > { %s1804_s15 = scalar_select %p1573_p6, 1, 0 }
  0x3c   : > { %p1163_p8 = pneg %p1573_p6  ;;  %s1067_s24 = sshll.u32 %s1416_s21, 8 }
  0x3d   : > { %s209_s27 = scalar_lea.vmem [#allocation2], %s1029_s23  ;;  %s1590_s7 = scalar_lea.hbm %s1775_s0, %s1067_s24 }
  0x3e   : > { %s216_s28 = sshll.u32 %s209_s27, 4  ;;  %p1583_p0 = pnand %p1163_p8, %p1786_p9  ;;  %s1592_s28 = int_to_ptr.vmem [resolvable:$true] %s216_s28 }
  0x3f   : > { %s1273_s1 = scalar_lea.vmem %s189_s17, 512  ;;  %p1281_p4 = scmp.lt.s32.totalorder %s189_s17, %s189_s17 }
  0x40   : > { %p1264_p10 = pneg %p1583_p0  ;;  %p1274_p11 = scmp.ne.s32.totalorder %s189_s17, %s1273_s1 }
  0x41   : > { %p1282_p8 = scmp.lt.s32.totalorder %s1273_s1, %s1273_s1 }
  0x42   : > { %p1276_p13 = pnand %p1274_p11, %p1264_p10 }
  0x43   : > { %p1283_p9 = por %p1282_p8, %p1281_p4 }
  0x44   : > { %p1277_p1 = pneg %p1276_p13 }
  0x46   : > { %p1284_p3 = pnand %p1283_p9, %p1277_p1 }
  0x48   : > { %1287 = shalt.err (!%p1284_p3)
}
  0x49   : > { %s1806_s6 = smov 8   ;;  %s1807_s23 = smov 128  }
  0x4a   : > { %1166 = dma.hbm_to_vmem [thread:$0]  (!%p1583_p0), %s1778_s3, 512, %s189_s17, [#allocation9], %s1807_s23, %s1807_s23, %s1806_s6  }
  0x4b   : > { %s206_s12 = scalar_lea.sflag [#allocation3], %s1498_s26  ;;  %s1288_s16 = scalar_lea.hbm %s1590_s7, 256 }
  0x4c   : > { %p1289_p10 = scmp.ne.s32.totalorder %s1590_s7, %s1288_s16  ;;  %s1293_s25 = scalar_lea.hbm %s1775_s0, 1024 }
  0x4d   : > { %p1294_p11 = scmp.lt.s32.totalorder %s1590_s7, %s1775_s0  ;;  %p1295_p13 = scmp.lt.s32.totalorder %s1293_s25, %s1288_s16 }
  0x4e   : > { %p1291_p9 = pnand %p1289_p10, %p1520_p7 }
  0x4f   : > { %p1296_p1 = por %p1295_p13, %p1294_p11 }
  0x50   : > { %p1292_p3 = pneg %p1291_p9 }
  0x52   : > { %p1297_p4 = pnand %p1296_p1, %p1292_p3 }
  0x54   : > { %1300 = shalt.err (!%p1297_p4)
}
  0x55   : > { %s1301_s17 = scalar_lea.vmem %s1592_s28, 256  ;;  %s1422_s24 = smov [#allocation2]  }
  0x56   : > { %p1302_p0 = scmp.ne.s32.totalorder %s1592_s28, %s1301_s17  ;;  %s1306_s27 = sshll.u32 %s1422_s24, 4  ;;  %s1307_s27 = int_to_ptr.vmem [resolvable:$false] %s1306_s27 }
  0x57   : > { %s1308_s1 = scalar_lea.vmem %s1307_s27, 512  ;;  %p1309_p9 = scmp.lt.s32.totalorder %s1592_s28, %s1307_s27 }
  0x58   : > { %p1304_p8 = pnand %p1302_p0, %p1520_p7  ;;  %p1310_p2 = scmp.lt.s32.totalorder %s1308_s1, %s1301_s17 }
  0x5a   : > { %p1305_p10 = pneg %p1304_p8  ;;  %p1311_p12 = por %p1310_p2, %p1309_p9 }
  0x5c   : > { %p1312_p6 = pnand %p1311_p12, %p1305_p10 }
  0x5e   : > { %1315 = shalt.err (!%p1312_p6)
}
  0x5f   : > { %1170 = dma.hbm_to_vmem [thread:$0]  (!%p1502_p5), %s1590_s7, 256, %s1592_s28, %s206_s12, %s1807_s23, %s1807_s23, %s1806_s6  }
  0x60   : > { %s1070_s20 = sshll.u32 %s1416_s21, 5  ;;  %s1808_s22 = sshll.u32 %s1498_s26, 1 }
  0x61   : > { %s252_s25 = scalar_lea.vmem [#allocation7], %s1808_s22  ;;  %s1635_s24 = scalar_lea.hbm %s1777_s2, %s1070_s20 }
  0x62   : > { %s259_s16 = sshll.u32 %s252_s25, 4  ;;  %s1316_s27 = scalar_lea.hbm %s1635_s24, 32  ;;  %s1637_s16 = int_to_ptr.vmem [resolvable:$true] %s259_s16 }
  0x63   : > { %p1317_p12 = scmp.ne.s32.totalorder %s1635_s24, %s1316_s27  ;;  %s1321_s26 = scalar_lea.hbm %s1777_s2, 128 }
  0x64   : > { %p1322_p3 = scmp.lt.s32.totalorder %s1635_s24, %s1777_s2  ;;  %p1323_p11 = scmp.lt.s32.totalorder %s1321_s26, %s1316_s27 }
  0x65   : > { %p1319_p2 = pnand %p1317_p12, %p1520_p7 }
  0x66   : > { %p1324_p13 = por %p1323_p11, %p1322_p3 }
  0x67   : > { %p1320_p6 = pneg %p1319_p2 }
  0x69   : > { %p1325_p1 = pnand %p1324_p13, %p1320_p6 }
  0x6b   : > { %1328 = shalt.err (!%p1325_p1)
}
  0x6c   : > { %s1329_s12 = scalar_lea.vmem %s1637_s16, 32  ;;  %s1423_s1 = smov [#allocation7]  }
  0x6d   : > { %p1330_p4 = scmp.ne.s32.totalorder %s1637_s16, %s1329_s12  ;;  %s1334_s20 = sshll.u32 %s1423_s1, 4  ;;  %s1335_s20 = int_to_ptr.vmem [resolvable:$false] %s1334_s20 }
  0x6e   : > { %s1336_s22 = scalar_lea.vmem %s1335_s20, 64  ;;  %p1337_p10 = scmp.lt.s32.totalorder %s1637_s16, %s1335_s20 }
  0x6f   : > { %p1332_p0 = pnand %p1330_p4, %p1520_p7  ;;  %p1338_p9 = scmp.lt.s32.totalorder %s1336_s22, %s1329_s12 }
  0x71   : > { %p1333_p8 = pneg %p1332_p0  ;;  %p1339_p12 = por %p1338_p9, %p1337_p10 }
  0x73   : > { %p1340_p2 = pnand %p1339_p12, %p1333_p8 }
  0x75   : > { %1343 = shalt.err (!%p1340_p2)
}
  0x76   : > { %s1424_s25 = smov 16   ;;  %s1425_s30 = smov 1  }
  0x77   : > { %1176 = dma.hbm_to_vmem [thread:$0]  (!%p1502_p5), %s1635_s24, 32, %s1637_s16, %s1514_s11, %s1424_s25, %s1424_s25, %s1425_s30  }
  0x78   : > { %p1809_p7 = scmp.ne.s32.totalorder %s1804_s15, 0 }
  0x79   : > { %s1663_s13 = sand.u32 (!%p1809_p7), 1, %s1408_s19   ;;  %p1810_p6 = scmp.ne.s32.totalorder (!%p1809_p7), %s1800_s14, 0 }
  0x7a   : > { %271 = sbr.rel (%p1809_p7) target bundleno = 1066 (0x42a), region = 40  ;;  %s1040_s17 = sshll.u32 (!%p1809_p7), %s1663_s13, 4 }
  0x7b   : > { %s274_s27 = scalar_lea.sflag (!%p1809_p7), [#allocation3], %s1663_s13  ;;  %s1669_s7 = scalar_lea.vmem (!%p1809_p7), [#allocation2], %s1040_s17 }
  0x7f   : > { %1387 = dma.done.wait (%p1810_p6), %s274_s27, 256  }
  0x80   : > { %1389 = vsyncadd (%p1810_p6), %s274_s27, 4294967040  ;;  %s282_s29 = sand.u32 1, %s1547_s9   ;;  %s1041_s11 = sshll.u32 %s1663_s13, 5 }
  0x81   : > { %s283_s15 = scalar_lea.sflag [#allocation6], %s282_s29  ;;  %s1677_s16 = scalar_lea.vmem [#allocation5], %s1041_s11 }
  0x82   : > { %1391 = dma.done.wait (%p1810_p6), %s283_s15, 544  }
  0x83   : > { %1393 = vsyncadd (%p1810_p6), %s283_s15, 4294966752  ;;  %s1042_s24 = sshll.u32 %s1663_s13, 1  ;;  %p1811_p5 = scmp.eq.s32.totalorder %s1547_s9, 0 }
  0x84   : > { %s1684_s28 = scalar_lea.vmem [#allocation7], %s1042_s24 }
  0x85   : > { %1395 = dma.done.wait (%p1811_p5), [#allocation9], 512   ;;  %p1812_p3 = pmov %p1811_p5 }
  0x86   : > { %v343_v0 = vld [vmem:[#allocation8 + $0x18] sm:$0xff]  ;;  %v342_v1 = vld [vmem:[#allocation8 + $0x10] sm:$0xff]  ;;  %v341_v2 = vld [vmem:[#allocation8 + $0x8] sm:$0xff]  ;;  %vm357_vm0 = vcmask 261120   ;;  %v1426_v10 = vmov 0.0   ;;  %vm1427_vm1 = vmmov 0  }
  0x87   : > { %1397 = vsyncadd (%p1812_p3), [#allocation9], 4294966784  ;;  %1109 = vmatprep.subr.mxu1 %v343_v0  ;;  %1098 = vmatprep.subr.mxu0 %v343_v0  ;;  %v347_v3 = vld [vmem:[%s1677_s16] sm:$0xff]  ;;  %v348_v5 = vld [vmem:[%s1677_s16 + $0x8] sm:$0xff]  ;;  %vm714_vm2 = vcmask 130048   ;;  %s335_s6 = scalar_lea.vmem [#allocation10], %s1040_s17 }
  0x88   : > { %1110 = vmatpush3.msra.mxu1 %v343_v0  ;;  %1099 = vmatpush3.msra.mxu0 %v343_v0  ;;  %v340_v4 = vld [vmem:[#allocation8] sm:$0xff]  ;;  %v349_v7 = vld [vmem:[%s1677_s16 + $0x10] sm:$0xff]  ;;  %v350_v9 = vld [vmem:[%s1677_s16 + $0x18] sm:$0xff]  ;;  %s899_s23 = sshll.u32 %s335_s6, 4  ;;  %s1071_s12 = sshll.u32 %s1547_s9, 8  ;;  %s1727_s23 = int_to_ptr.vmem [resolvable:$true] %s899_s23 }
  0x89   : > { %1111 = vmatprep.subr.mxu1 %v342_v1  ;;  %1100 = vmatprep.subr.mxu0 %v342_v1  ;;  %v345_v6 = vld [vmem:[%s1669_s7] sm:$0xff]  ;;  %v346_v8 = vld [vmem:[%s1669_s7 + $0x8] sm:$0xff]  ;;  %s1732_s22 = scalar_lea.hbm %s1780_s5, %s1071_s12  ;;  %s886_s25 = scalar_lea.sflag [#allocation4], %s1663_s13 }
  0x8a   : > { %1112 = vmatpush3.msra.mxu1 %v342_v1  ;;  %1101 = vmatpush3.msra.mxu0 %v342_v1  ;;  %v1045_v11 = vld [vmem:[%s1779_s4] ss:$0 sm:$0xff]  ;;  %v1053_v34 = vld [vmem:[%s1684_s28 + $0x1] ss:$0 sm:$0xff]  ;;  %s1344_s9 = scalar_lea.vmem %s1727_s23, 256  ;;  %p1813_p13 = scmp.ne.s32.totalorder %s1802_s8, 0 }
  0x8b   : > { %1113 = vmatprep.subr.mxu1 %v341_v2  ;;  %1117 = vmatprep.mubr.msk.f32.mxu1 %vm357_vm0, %v347_v3  ;;  %v1052_v30 = vld [vmem:[%s1684_s28] ss:$0 sm:$0xff]  ;;  %p1345_p11 = scmp.ne.s32.totalorder %s1727_s23, %s1344_s9  ;;  %s1428_s30 = smov [#allocation10]  }
  0x8c   : > { %1114 = vmatpush3.msra.mxu1 %v341_v2  ;;  %1102 = vmatprep.subr.mxu0 %v341_v2  ;;  %s1348_s17 = sshll.u32 %s1428_s30, 4  ;;  %s1349_s17 = int_to_ptr.vmem [resolvable:$false] %s1348_s17 }
  0x8d   : > { %1115 = vmatprep.subr.mxu1 %v340_v4  ;;  %1103 = vmatpush3.msra.mxu0 %v341_v2  ;;  %p1346_p1 = pnand %p1345_p11, %p1813_p13  ;;  %s1350_s27 = scalar_lea.vmem %s1349_s17, 512 }
  0x8e   : > { %1116 = vmatpush3.msra.mxu1 %v340_v4  ;;  %1104 = vmatprep.subr.mxu0 %v340_v4  ;;  %p1351_p0 = scmp.lt.s32.totalorder %s1727_s23, %s1349_s17  ;;  %p1352_p8 = scmp.lt.s32.totalorder %s1350_s27, %s1344_s9 }
  0x8f   : > { %1118 = vmatmul.mubr.msk.f32.vlgmr.msra.gmra.mxu1 %vm357_vm0, %v348_v5  ;;  %1105 = vmatpush3.msra.mxu0 %v340_v4  ;;  %p1347_p4 = pneg %p1346_p1 }
  0x90   : > { %1106 = vmatprep.mubr.msk.f32.mxu0 %vm357_vm0, %v345_v6  ;;  %1120 = vmatprep.mubr.msk.f32.mxu1 %vm357_vm0, %v349_v7  ;;  %p1353_p10 = por %p1352_p8, %p1351_p0 }
  0x91   : > { %1107 = vmatmul.mubr.msk.f32.vlgmr.msra.gmra.mxu0 %vm357_vm0, %v346_v8  ;;  %1123 = vmatprep.subr.mxu0 %v1426_v10 }
  0x92   : > { %1130 = vmatprep.subr.mxu1 %v1426_v10  ;;  %1127 = vmatprep.mubr.msk.f32.mxu0 %vm1427_vm1, %v1426_v10  ;;  %p1354_p9 = pnand %p1353_p10, %p1347_p4 }
  0x93   : > { %1121 = vmatmul.mubr.msk.f32.gmra.mxu1 %vm357_vm0, %v350_v9 }
  0x94   : > { %1134 = vmatprep.mubr.msk.f32.mxu1 %vm1427_vm1, %v1426_v10 }
 0x14f   : > { %v1119_v12 = vpop.f32.mrf.mxu1 }
 0x150   : > { %v523_v13 = vadd.f32 %v1119_v12, %v1045_v11 }
 0x151   : > { %v517_v14 = vpop.f32.mrf.mxu1  ;;  %v1108_v15 = vpop.f32.mrf.mxu0 }
 0x152   : > { %v539_v16 = vmax.f32 %v523_v13, 0.0  ;;  %v518_v17 = vadd.f32 %v1045_v11, %v517_v14  ;;  %v436_v26 = vadd.f32 %v1108_v15, %v1045_v11 }
 0x153   : > { %v1122_v18 = vpop.f32.mrf.mxu1  ;;  %v430_v19 = vpop.f32.mrf.mxu0 }
 0x154   : > { %v533_v20 = vadd.f32 %v1122_v18, %v1045_v11  ;;  %1124 = vmatpush3.xpose.msk.msra.mxu0 %vm357_vm0, %v539_v16  ;;  %v431_v21 = vadd.f32 %v1045_v11, %v430_v19  ;;  %v538_v23 = vmax.f32 %v518_v17, 0.0  ;;  %v537_v29 = vmax.f32 %v436_v26, 0.0 }
 0x155   : > { %v527_v22 = vpop.f32.mrf.mxu1  ;;  %1125 = vmatprep.subr.mxu0 %v1426_v10 }
 0x156   : > { %v541_v24 = vmax.f32 %v533_v20, 0.0  ;;  %v528_v25 = vadd.f32 %v1045_v11, %v527_v22  ;;  %v536_v27 = vmax.f32 %v431_v21, 0.0 }
 0x158   : > { %1126 = vmatpush3.xpose.msk.msra.mxu0 %vm357_vm0, %v538_v23  ;;  %1131 = vmatpush3.xpose.msk.msra.mxu1 %vm357_vm0, %v541_v24  ;;  %v540_v28 = vmax.f32 %v528_v25, 0.0 }
 0x159   : > { %1132 = vmatprep.subr.mxu1 %v1426_v10  ;;  %1137 = vmatprep.subr.mxu0 %v1426_v10 }
 0x15b   : > { %1128 = vmatmul.mubr.msk.f32.vlgmr.msra.gmra.mxu0 %vm357_vm0, %v536_v27 }
 0x15c   : > { %1133 = vmatpush3.xpose.msk.msra.mxu1 %vm357_vm0, %v540_v28  ;;  %1138 = vmatpush3.msra.mxu0 %v348_v5 }
 0x15d   : > { %1139 = vmatprep.subr.mxu0 %v1426_v10  ;;  %1141 = vmatprep.mubr.msk.f32.mxu0 %vm1427_vm1, %v1426_v10 }
 0x15e   : > { %1140 = vmatpush3.msra.mxu0 %v347_v3  ;;  %1144 = vmatprep.subr.mxu1 %v1426_v10 }
 0x15f   : > { %1135 = vmatmul.mubr.msk.f32.vlgmr.msra.gmra.mxu1 %vm357_vm0, %v537_v29 }
 0x160   : > { %1145 = vmatpush3.msra.mxu1 %v350_v9  ;;  %1148 = vmatprep.mubr.msk.f32.mxu1 %vm1427_vm1, %v1426_v10 }
 0x161   : > { %1146 = vmatprep.subr.mxu1 %v1426_v10 }
 0x162   : > { %1147 = vmatpush3.msra.mxu1 %v349_v7 }
 0x21b   : > { %v631_v31 = vpop.f32.mrf.mxu0 }
 0x21c   : > { %v632_v32 = vadd.f32 %v1052_v30, %v631_v31 }
 0x21d   : > { %v1129_v33 = vpop.f32.mrf.mxu0 }
 0x21e   : > { %v715_v35 = vsel %vm714_vm2, %v632_v32, -inf }
 0x21f   : > { %v710_v36 = vpop.f32.mrf.mxu1  ;;  %716 = vmax.xlane.f32.xlu0 %v715_v35 }
 0x220   : > { %v711_v37 = vadd.f32 %v1053_v34, %v710_v36 }
 0x221   : > { %v1136_v38 = vpop.f32.mrf.mxu1 }
 0x222   : > { %v718_v39 = vsel %vm714_vm2, %v711_v37, -inf }
 0x223   : > { %719 = vmax.xlane.f32.xlu0 %v718_v39 }
 0x2a8   : > { %v717_v40 = vpop.xlane.xlu0 %716 }
 0x2a9   : > { %v721_v41 = vsub.f32 %v632_v32, %v717_v40 }
 0x2ab   : > { %v723_v42 = vmul.f32 1.442695, %v721_v41 }
 0x2ac   : > { %v720_v43 = vpop.xlane.xlu0 %719 }
 0x2ad   : > { %1226 = vpow2.f32 %v723_v42  ;;  %v722_v44 = vsub.f32 %v711_v37, %v720_v43 }
 0x2af   : > { %v725_v45 = vmul.f32 1.442695, %v722_v44 }
 0x2b1   : > { %1228 = vpow2.f32 %v725_v45 }
 0x2ba   : > { %v1227_v46 = vpop.eup %1226 }
 0x2bb   : > { %v727_v47 = vsel %vm714_vm2, %v1227_v46, 0.0 }
 0x2bc   : > { %728 = vadd.xlane.f32.xlu1 %v727_v47 }
 0x2be   : > { %v1229_v48 = vpop.eup %1228 }
 0x2bf   : > { %v730_v49 = vsel %vm714_vm2, %v1229_v48, 0.0 }
 0x2c0   : > { %731 = vadd.xlane.f32.xlu1 %v730_v49 }
 0x345   : > { %v729_v50 = vpop.xlane.xlu1 %728 }
 0x346   : > { %1230 = vrcp.f32 %v729_v50 }
 0x349   : > { %v732_v51 = vpop.xlane.xlu1 %731 }
 0x34a   : > { %1232 = vrcp.f32 %v732_v51 }
 0x353   : > { %v1231_v52 = vpop.eup %1230 }
 0x354   : > { %v735_v53 = vmul.f32 %v1231_v52, %v1227_v46 }
 0x356   : > { %1142 = vmatmul.mubr.msk.f32.vlgmr.msra.gmra.mxu0 %vm714_vm2, %v735_v53 }
 0x357   : > { %v1233_v54 = vpop.eup %1232 }
 0x358   : > { %v736_v55 = vmul.f32 %v1233_v54, %v1229_v48 }
 0x35a   : > { %1149 = vmatmul.mubr.msk.f32.vlgmr.msra.gmra.mxu1 %vm714_vm2, %v736_v55 }
 0x416   : > { %v806_v56 = vpop.f32.mrf.mxu0 }
 0x417   : > { %883 = vst.msk [vmem:[%s335_s6] sm:$0xff] %vm357_vm0, %v806_v56 }
 0x418   : > { %v1143_v57 = vpop.f32.mrf.mxu0 }
 0x41a   : > { %v879_v58 = vpop.f32.mrf.mxu1 }
 0x41b   : > { %884 = vst.msk [vmem:[%s335_s6 + $0x8] sm:$0xff] %vm357_vm0, %v879_v58 }
 0x41c   : > { %v1150_v59 = vpop.f32.mrf.mxu1 }
 0x41d   : > { %1357 = shalt.err (!%p1354_p9)
}
 0x41e   : > { %s1358_s7 = scalar_lea.hbm %s1732_s22, 256  ;;  %s1362_s15 = scalar_lea.hbm %s1780_s5, 1024 }
 0x41f   : > { %p1359_p12 = scmp.ne.s32.totalorder %s1732_s22, %s1358_s7  ;;  %p1363_p6 = scmp.lt.s32.totalorder %s1732_s22, %s1780_s5 }
 0x420   : > { %p1364_p5 = scmp.lt.s32.totalorder %s1362_s15, %s1358_s7 }
 0x421   : > { %p1360_p2 = pnand %p1359_p12, %p1813_p13 }
 0x422   : > { %p1365_p3 = por %p1364_p5, %p1363_p6 }
 0x423   : > { %p1361_p7 = pneg %p1360_p2 }
 0x425   : > { %p1366_p11 = pnand %p1365_p3, %p1361_p7 }
 0x427   : > { %1369 = shalt.err (!%p1366_p11)
}
 0x428   : > { %s1429_s28 = smov 128   ;;  %s1430_s14 = smov 8  }
 0x429   : > { %1161 = dma.vmem_to_hbm [thread:$0]  (%p1813_p13), %s1727_s23, 256, %s1732_s22, %s886_s25, %s1429_s28, %s1429_s28, %s1430_s14  }
 0x42a PF: > { %p1184_p1 = scmp.ge.s32.totalorder %s1416_s21, 2  ;;  %s914_s26 = sand.u32 1, %s1404_s18  }
 0x42b   : > { %p1814_p4 = scmp.ne.s32.totalorder %s1803_s10, 0  ;;  %s915_s6 = scalar_lea.sflag [#allocation4], %s914_s26 }
 0x42d   : > { %p1178_p0 = pnand %p1184_p1, %p1814_p4 }
 0x42f   : > { %p1179_p8 = pneg %p1178_p0 }
 0x431   : > { %1399 = dma.done.wait (%p1179_p8), %s915_s6, 256  }
 0x432   : > { %1401 = vsyncadd (%p1179_p8), %s915_s6, 4294967040  ;;  %s1815_s21 = sld [smem:[#allocation16_spill]]  ;;  %s1818_s18 = smov %s1408_s19 }
 0x433   : > { %s1816_s12 = sld [smem:[#allocation15_spill]] }
 0x434   : > { %s1817_s20 = sld [smem:[#allocation17_spill]] }
 0x438   : > { %p22_p10 = scmp.ge.s32.totalorder %s1815_s21, 6  }
 0x439   : > { %s1819_s19 = smov %s1816_s12 }
 0x43a   :  { %24 = sbr.rel (!%p22_p10) target bundleno = 10 (0xa), region = 113 }
 0x43f   :  { %920 = vsyncpa [#allocation3], 1 }
 0x440   :  { %922 = vsyncpa [#allocation3 + $0x1], 1 }
 0x441   :  { %923 = vsyncpa [#allocation6], 1 }
 0x442   :  { %925 = vsyncpa [#allocation6 + $0x1], 1 }
 0x443   :  { %926 = vsyncpa [#allocation9], 1 }
 0x444   :  { %927 = vsyncpa [#allocation4], 1 }
 0x445   :  { %929 = vsyncpa [#allocation4 + $0x1], 1 }

</bundles_post_ra>
